<compile_context>
chip_gen: v6e
topology: v6e:2x2x1
jax: 0.10.0
libtpu: 0.0.40
codegen_flags: <defaults>
</compile_context>

<pallas_src>
import jax
import jax.numpy as jnp
from jax.experimental import pallas as pl
from jax.experimental.pallas import tpu as pltpu  # noqa: F401  (TPU backend)

BN_EPS = 1e-5


# ----------------------------------------------------------------------------
# Fused kernel: BatchNorm1d (batch stats) -> ReLU -> Linear
# ----------------------------------------------------------------------------
def _decoder_kernel(z_ref, gamma_ref, beta_ref, w_ref, b_ref, o_ref):
    x = z_ref[...].astype(jnp.float32)                       # (M, Din)
    m = x.shape[0]
    inv_m = jnp.float32(1.0 / m)

    # Single-pass per-channel batch statistics over all rows (B*T).
    s1 = jnp.sum(x, axis=0, keepdims=True)                   # (1, Din)
    s2 = jnp.sum(x * x, axis=0, keepdims=True)                # (1, Din)
    mean = s1 * inv_m
    var = s2 * inv_m - mean * mean                            # biased var (PyTorch train)

    # Fold normalize + affine into one per-channel scale/shift (rsqrt -> EUP).
    scale = gamma_ref[...] * jax.lax.rsqrt(var + jnp.float32(BN_EPS))   # (1, Din)
    shift = beta_ref[...] - mean * scale                                 # (1, Din)

    # Per-element: one fma + relu.
    h = jnp.maximum(x * scale + shift, jnp.float32(0.0))     # (M, Din)

    # Linear: (M, Din) @ (Din, Dout) + bias, straight onto the MXU.
    y = jnp.dot(h, w_ref[...], preferred_element_type=jnp.float32) + b_ref[...]
    o_ref[...] = y.astype(o_ref.dtype)


def simple_decoder_forward(params, z, gmm_num=0):
    """Mirrors SimpleDecoder.forward for 2D (B, Din) or 3D (B, T, Din) input."""
    gamma, beta, w, b = params["gamma"], params["beta"], params["w"], params["b"]
    din, dout = w.shape

    if z.ndim == 3:
        B, T, _ = z.shape
        x2d = z.reshape(B * T, din)
    elif z.ndim == 2:
        x2d = z
    else:
        # TODO(synk): ndim outside (2,3) skips BatchNorm in the reference; not needed here.
        raise NotImplementedError("SimpleDecoder Pallas kernel supports 2D/3D inputs")

    M = x2d.shape[0]
    out2d = pl.pallas_call(
        _decoder_kernel,
        out_shape=jax.ShapeDtypeStruct((M, dout), jnp.float32),
        cost_estimate=pl.CostEstimate(
            flops=2 * M * din * dout + 8 * M * din,
            transcendentals=din,
            bytes_accessed=4 * (M * din + din * dout + M * dout + 2 * din + dout),
        ),
    )(x2d, gamma, beta, w, b)

    out = out2d.reshape(z.shape[0], z.shape[1], dout) if z.ndim == 3 else out2d

    if gmm_num:
        # out.view(*out.shape[:-1], -1, gmm_num, 2).permute(3,0,1,2,4).squeeze()
        # (pure layout glue; only well-defined for the 3D-input case)
        assert z.ndim == 3, "gmm reshape path requires 3D input"
        out = out.reshape(out.shape[0], out.shape[1], -1, gmm_num, 2)
        out = jnp.transpose(out, (3, 0, 1, 2, 4))
        out = jnp.squeeze(out)
    return out


# ----------------------------------------------------------------------------
# Main
# ----------------------------------------------------------------------------
if __name__ == "__main__":
    B, T, Din, Dout = 2, 8, 32, 128  # Dout=128 -> lane-dense output stores

    key = jax.random.PRNGKey(0)
    kz, kz2, kw = jax.random.split(key, 3)

    params = {
        # Fresh nn.BatchNorm1d: gamma=1, beta=0.
        "gamma": jnp.ones((1, Din), jnp.float32),
        "beta": jnp.zeros((1, Din), jnp.float32),
        # Linear weight stored pre-transposed as (Din, Dout).
        "w": jax.random.normal(kw, (Din, Dout), jnp.float32) * 0.05,
        "b": jnp.zeros((1, Dout), jnp.float32),
    }

    # --- 3D path (B, T, Din) ---
    z3 = jax.random.normal(kz, (B, T, Din), jnp.float32)
    out3 = simple_decoder_forward(params, z3)
    jax.block_until_ready(out3)
    assert out3.shape == (B, T, Dout)
    assert jnp.isfinite(out3).all()

    # Pure-JAX reference check (training-mode BN -> ReLU -> Linear).
    x2d = z3.reshape(B * T, Din)
    mean = x2d.mean(axis=0, keepdims=True)
    var = ((x2d - mean) ** 2).mean(axis=0, keepdims=True)
    href = jnp.maximum((x2d - mean) / jnp.sqrt(var + BN_EPS) * params["gamma"]
                       + params["beta"], 0.0)
    ref3 = (href @ params["w"] + params["b"]).reshape(B, T, Dout)
    assert jnp.allclose(out3, ref3, rtol=1e-4, atol=1e-4)

    # --- 2D path (B, Din) ---
    z2 = jax.random.normal(kz2, (B * T, Din), jnp.float32)
    out2 = simple_decoder_forward(params, z2)
    jax.block_until_ready(out2)
    assert out2.shape == (B * T, Dout)
    assert jnp.isfinite(out2).all()

    # 2D reference.
    mean2 = z2.mean(axis=0, keepdims=True)
    var2 = ((z2 - mean2) ** 2).mean(axis=0, keepdims=True)
    href2 = jnp.maximum((z2 - mean2) / jnp.sqrt(var2 + BN_EPS) * params["gamma"]
                        + params["beta"], 0.0)
    ref2 = href2 @ params["w"] + params["b"]
    assert jnp.allclose(out2, ref2, rtol=1e-4, atol=1e-4)

    print("KERNEL_OK")
</pallas_src>

<mosaic_0001>
module attributes {stable_mosaic.version = 11 : i64} {
  func.func @_decoder_kernel(%arg0: memref<16x32xf32, #tpu.memory_space<vmem>>, %arg1: memref<1x32xf32, #tpu.memory_space<vmem>>, %arg2: memref<1x32xf32, #tpu.memory_space<vmem>>, %arg3: memref<32x128xf32, #tpu.memory_space<vmem>>, %arg4: memref<1x128xf32, #tpu.memory_space<vmem>>, %arg5: memref<16x128xf32, #tpu.memory_space<vmem>>) attributes {dimension_semantics = [], scalar_prefetch = 0 : i64, scratch_operands = 0 : i64, tpu.core_type = #tpu.core_type<tc>} {
    %c0 = arith.constant 0 : index
    %c0_0 = arith.constant 0 : index
    %0 = vector.load %arg0[%c0, %c0_0] : memref<16x32xf32, #tpu.memory_space<vmem>>, vector<16x32xf32>
    %cst = arith.constant dense<0.000000e+00> : vector<32xf32>
    %1 = vector.multi_reduction <add>, %0, %cst [0] : vector<16x32xf32> to vector<32xf32>
    %2 = vector.shape_cast %1 : vector<32xf32> to vector<1x32xf32>
    %3 = arith.mulf %0, %0 : vector<16x32xf32>
    %cst_1 = arith.constant dense<0.000000e+00> : vector<32xf32>
    %4 = vector.multi_reduction <add>, %3, %cst_1 [0] : vector<16x32xf32> to vector<32xf32>
    %5 = vector.shape_cast %4 : vector<32xf32> to vector<1x32xf32>
    %cst_2 = arith.constant 6.250000e-02 : f32
    %6 = vector.broadcast %cst_2 : f32 to vector<1x32xf32>
    %7 = arith.mulf %2, %6 : vector<1x32xf32>
    %cst_3 = arith.constant 6.250000e-02 : f32
    %8 = vector.broadcast %cst_3 : f32 to vector<1x32xf32>
    %9 = arith.mulf %5, %8 : vector<1x32xf32>
    %10 = arith.mulf %7, %7 : vector<1x32xf32>
    %11 = arith.subf %9, %10 : vector<1x32xf32>
    %c0_4 = arith.constant 0 : index
    %c0_5 = arith.constant 0 : index
    %12 = vector.load %arg1[%c0_4, %c0_5] : memref<1x32xf32, #tpu.memory_space<vmem>>, vector<1x32xf32>
    %cst_6 = arith.constant 9.99999974E-6 : f32
    %13 = vector.broadcast %cst_6 : f32 to vector<1x32xf32>
    %14 = arith.addf %11, %13 : vector<1x32xf32>
    %15 = math.rsqrt %14 : vector<1x32xf32>
    %16 = arith.mulf %12, %15 : vector<1x32xf32>
    %c0_7 = arith.constant 0 : index
    %c0_8 = arith.constant 0 : index
    %17 = vector.load %arg2[%c0_7, %c0_8] : memref<1x32xf32, #tpu.memory_space<vmem>>, vector<1x32xf32>
    %18 = arith.mulf %7, %16 : vector<1x32xf32>
    %19 = arith.subf %17, %18 : vector<1x32xf32>
    %20 = vector.broadcast %16 : vector<1x32xf32> to vector<16x32xf32>
    %21 = arith.mulf %0, %20 : vector<16x32xf32>
    %22 = vector.broadcast %19 : vector<1x32xf32> to vector<16x32xf32>
    %23 = arith.addf %21, %22 : vector<16x32xf32>
    %cst_9 = arith.constant 0.000000e+00 : f32
    %24 = vector.broadcast %cst_9 : f32 to vector<16x32xf32>
    %25 = arith.maximumf %23, %24 : vector<16x32xf32>
    %c0_10 = arith.constant 0 : index
    %c0_11 = arith.constant 0 : index
    %26 = vector.load %arg3[%c0_10, %c0_11] : memref<32x128xf32, #tpu.memory_space<vmem>>, vector<32x128xf32>
    %cst_12 = arith.constant dense<0.000000e+00> : vector<16x128xf32>
    %27 = tpu.matmul %25, %26, %cst_12 {dimension_numbers = #tpu.dot_dimension_numbers<[1], [0], [0], [1], [0, 0, 1, 1], [], []>} : vector<16x32xf32>, vector<32x128xf32>, vector<16x128xf32> -> vector<16x128xf32>
    %c0_13 = arith.constant 0 : index
    %c0_14 = arith.constant 0 : index
    %28 = vector.load %arg4[%c0_13, %c0_14] : memref<1x128xf32, #tpu.memory_space<vmem>>, vector<1x128xf32>
    %29 = vector.broadcast %28 : vector<1x128xf32> to vector<16x128xf32>
    %30 = arith.addf %27, %29 : vector<16x128xf32>
    %c0_15 = arith.constant 0 : index
    %c0_16 = arith.constant 0 : index
    %31 = vector.load %arg5[%c0_15, %c0_16] : memref<16x128xf32, #tpu.memory_space<vmem>>, vector<16x128xf32>
    tpu.vector_store %arg5[%c0_15, %c0_16], %30 {strides = array<i32>} : memref<16x128xf32, #tpu.memory_space<vmem>>, vector<16x128xf32>,
    return
  }
}

</mosaic_0001>

<bundles_post_ra>
// kernel: tpu_custom_call.1
= control target key start
LH: loop header
LB: loop body
LE: loop exit
PB: predicated region body
PF: predicated region fallthrough
CT: control target
= control target key end

     0   :  { %10 = vsyncpa [#allocation3], 0  ;;  %s374_s0 = inlined_call_operand.hbm [shape: f32[16,32], index: 0, kind: input, shape index: {}]   ;;  %s375_s1 = inlined_call_operand.vmem [shape: f32[1,32], index: 1, kind: input, shape index: {}]   ;;  %s376_s2 = inlined_call_operand.vmem [shape: f32[1,32], index: 2, kind: input, shape index: {}]   ;;  %s377_s3 = inlined_call_operand.hbm [shape: f32[32,128], index: 3, kind: input, shape index: {}]   ;;  %s378_s4 = inlined_call_operand.vmem [shape: f32[1,128], index: 4, kind: input, shape index: {}]   ;;  %s379_s5 = inlined_call_operand.hbm [shape: f32[16,128], index: 5, kind: output, shape index: {}]  }
   0x1   :  { %11 = vsyncpa [#allocation6], 0 }
   0x2   :  { %12 = vsyncpa [#allocation4], 0  ;;  %s306_s18 = smov [#allocation2]  }
   0x3   :  { %s18_s19 = sshll.u32 %s306_s18, 4  ;;  %s19_s19 = int_to_ptr.vmem [resolvable:$true] %s18_s19 }
   0x4   :  { %s248_s20 = scalar_lea.vmem %s19_s19, 256  ;;  %p253_p1 = scmp.lt.s32.totalorder %s19_s19, %s19_s19 }
   0x5   :  { %p249_p0 = scmp.ne.s32.totalorder %s19_s19, %s248_s20  ;;  %p254_p2 = scmp.lt.s32.totalorder %s248_s20, %s248_s20 }
   0x7   :  { %p255_p3 = por %p254_p2, %p253_p1 }
   0x9   :  { %p256_p4 = pnand %p255_p3, %p249_p0 }
   0xb   :  { %259 = shalt.err (!%p256_p4)
}
   0xc   :  { %s307_s21 = smov 128   ;;  %s308_s22 = smov 8  }
   0xd   :  { %24 = dma.hbm_to_vmem [thread:$0]  %s374_s0, 256, %s19_s19, [#allocation3], %s307_s21, %s307_s21, %s308_s22  }
   0xe   :  { %s309_s25 = smov [#allocation5]  }
   0xf   :  { %s34_s26 = sshll.u32 %s309_s25, 4  ;;  %s35_s26 = int_to_ptr.vmem [resolvable:$true] %s34_s26 }
  0x10   :  { %s268_s27 = scalar_lea.vmem %s35_s26, 512  ;;  %p273_p6 = scmp.lt.s32.totalorder %s35_s26, %s35_s26 }
  0x11   :  { %p269_p5 = scmp.ne.s32.totalorder %s35_s26, %s268_s27  ;;  %p274_p7 = scmp.lt.s32.totalorder %s268_s27, %s268_s27 }
  0x13   :  { %p275_p8 = por %p274_p7, %p273_p6 }
  0x15   :  { %p276_p9 = pnand %p275_p8, %p269_p5 }
  0x17   :  { %279 = shalt.err (!%p276_p9)
}
  0x18   :  { %40 = dma.hbm_to_vmem [thread:$0]  %s377_s3, 512, %s35_s26, [#allocation6], %s307_s21, %s307_s21, %s308_s22  }
  0x19   :  { %300 = dma.done.wait [#allocation3], 256  }
  0x1a   :  { %301 = vsyncadd [#allocation3], 4294967040 }
  0x1b   :  { %302 = dma.done.wait [#allocation6], 512  }
  0x1c   :  { %303 = vsyncadd [#allocation6], 4294966784  ;;  %vm51_vm0 = vcmask 261120   ;;  %v104_v0 = vld [vmem:[#allocation5 + $0x18] sm:$0xff]  ;;  %v103_v1 = vld [vmem:[#allocation5 + $0x10] sm:$0xff]  ;;  %v84_v31 = vlaneseq }
  0x1d   :  { %222 = vmatprep.subr.mxu0 %v104_v0  ;;  %v49_v2 = vld [vmem:[#allocation2] sm:$0xff]  ;;  %v50_v3 = vld [vmem:[#allocation2 + $0x8] sm:$0xff]  ;;  %v102_v4 = vld [vmem:[#allocation5 + $0x8] sm:$0xff] }
  0x1e   :  { %223 = vmatpush3.msra.mxu0 %v104_v0  ;;  %v52_v5 = vsel %vm51_vm0, %v49_v2, 0.0  ;;  %v53_v6 = vsel %vm51_vm0, %v50_v3, 0.0  ;;  %v61_v7 = vmul.f32 %v49_v2, %v49_v2  ;;  %v62_v8 = vmul.f32 %v50_v3, %v50_v3  ;;  %v101_v10 = vld [vmem:[#allocation5] sm:$0xff]  ;;  %v76_v33 = vld [vmem:[%s375_s1] sm:$0x1] }
  0x1f   :  { %224 = vmatprep.subr.mxu0 %v103_v1  ;;  %v54_v9 = vadd.f32 %v53_v6, %v52_v5  ;;  %v85_v32 = vshrl.u32 %v84_v31, 7  ;;  %v80_v37 = vld [vmem:[%s376_s2] sm:$0x1]  ;;  %s310_s2 = smov [#allocation7]  }
  0x20   :  { %225 = vmatpush3.msra.mxu0 %v103_v1  ;;  %v63_v11 = vsel %vm51_vm0, %v61_v7, 0.0  ;;  %v64_v12 = vsel %vm51_vm0, %v62_v8, 0.0  ;;  %v213_v48 = vld [vmem:[%s378_s4] ss:$0 sm:$0xff]  ;;  %s200_s8 = sshll.u32 %s310_s2, 4  ;;  %s201_s8 = int_to_ptr.vmem [resolvable:$true] %s200_s8 }
  0x21   :  { %226 = vmatprep.subr.mxu0 %v102_v4  ;;  %v55_v13 = vrot.slane %v54_v9, 4  ;;  %v65_v14 = vadd.f32 %v64_v12, %v63_v11  ;;  %v86_v34 = vsub.s32 0, %v85_v32  ;;  %s280_s9 = scalar_lea.vmem %s201_s8, 256  ;;  %p285_p11 = scmp.lt.s32.totalorder %s201_s8, %s201_s8 }
  0x22   :  { %227 = vmatpush3.msra.mxu0 %v102_v4  ;;  %p281_p10 = scmp.ne.s32.totalorder %s201_s8, %s280_s9  ;;  %p286_p12 = scmp.lt.s32.totalorder %s280_s9, %s280_s9 }
  0x23   :  { %228 = vmatprep.subr.mxu0 %v101_v10  ;;  %v56_v15 = vadd.f32 %v55_v13, %v54_v9  ;;  %v66_v16 = vrot.slane %v65_v14, 4 }
  0x24   :  { %229 = vmatpush3.msra.mxu0 %v101_v10  ;;  %p287_p13 = por %p286_p12, %p285_p11 }
  0x25   :  { %v57_v17 = vrot.slane %v56_v15, 2  ;;  %v67_v18 = vadd.f32 %v66_v16, %v65_v14 }
  0x26   :  { %p288_p0 = pnand %p287_p13, %p281_p10 }
  0x27   :  { %v58_v19 = vadd.f32 %v57_v17, %v56_v15  ;;  %v68_v20 = vrot.slane %v67_v18, 2 }
  0x29   :  { %v59_v21 = vrot.slane %v58_v19, 1  ;;  %v69_v22 = vadd.f32 %v68_v20, %v67_v18 }
  0x2b   :  { %v60_v23 = vadd.f32 %v59_v21, %v58_v19  ;;  %v70_v24 = vrot.slane %v69_v22, 1 }
  0x2d   :  { %v71_v25 = vadd.f32 %v70_v24, %v69_v22  ;;  %v72_v26 = vmul.f32 0.0625, %v60_v23 }
  0x2f   :  { %v73_v27 = vmul.f32 0.0625, %v71_v25  ;;  %v74_v28 = vmul.f32 %v72_v26, %v72_v26 }
  0x31   :  { %v75_v29 = vsub.f32 %v73_v27, %v74_v28 }
  0x33   :  { %v77_v30 = vadd.f32 1e-05, %v75_v29 }
  0x35   :  { %238 = vrsqrt.f32 %v77_v30 }
  0x42   :  { %v239_v35 = vpop.eup %238 }
  0x43   :  { %v79_v36 = vmul.f32 %v239_v35, %v76_v33 }
  0x45   :  { %v81_v38 = vmul.f32 %v79_v36, %v72_v26  ;;  %v87_v39 = vrot.slane %v79_v36, %v86_v34 }
  0x47   :  { %v82_v40 = vsub.f32 %v80_v37, %v81_v38  ;;  %v89_v41 = vmul.f32 %v87_v39, %v49_v2  ;;  %v90_v42 = vmul.f32 %v87_v39, %v50_v3 }
  0x49   :  { %v95_v43 = vrot.slane %v82_v40, %v86_v34 }
  0x4b   :  { %v97_v44 = vadd.f32 %v95_v43, %v89_v41  ;;  %v98_v45 = vadd.f32 %v95_v43, %v90_v42 }
  0x4d   :  { %v99_v46 = vmax.f32 %v97_v44, 0.0  ;;  %v100_v47 = vmax.f32 %v98_v45, 0.0 }
  0x4f   :  { %230 = vmatprep.mubr.msk.f32.mxu0 %vm51_vm0, %v99_v46 }
  0x50   :  { %231 = vmatmul.mubr.msk.f32.vlgmr.msra.gmra.mxu0 %vm51_vm0, %v100_v47 }
 0x110   :  { %v232_v49 = vpop.f32.mrf.mxu0 }
 0x111   :  { %v190_v50 = vadd.f32 %v232_v49, %v213_v48 }
 0x112   :  { %v184_v51 = vpop.f32.mrf.mxu0 }
 0x113   :  { %194 = vst [vmem:[#allocation7 + $0x8] sm:$0xff] %v190_v50  ;;  %v185_v52 = vadd.f32 %v213_v48, %v184_v51 }
 0x115   :  { %193 = vst [vmem:[#allocation7] sm:$0xff] %v185_v52 }
 0x116   :  { %291 = shalt.err (!%p288_p0)
}
 0x117   :  { %206 = dma.vmem_to_hbm [thread:$0]  %s201_s8, 256, %s379_s5, [#allocation4], %s307_s21, %s307_s21, %s308_s22  }
 0x118   :  { %304 = dma.done.wait [#allocation4], 256  }
 0x119   :  { %305 = vsyncadd [#allocation4], 4294967040 }
 0x11a   :  { %210 = vsyncpa [#allocation3], 1 }
 0x11b   :  { %211 = vsyncpa [#allocation6], 1 }
 0x11c   :  { %212 = vsyncpa [#allocation4], 1 }

</bundles_post_ra>
